<compile_context>
chip_gen: v6e
topology: v6e:2x2x1
jax: 0.10.0
libtpu: 0.0.40
codegen_flags: <defaults>
</compile_context>

<pallas_src>
import jax
import jax.numpy as jnp
from jax.experimental import pallas as pl
from jax.experimental.pallas import tpu as pltpu

EPS = 1e-5


def _cin_kernel(x_ref, alpha_ref, beta_ref, o_ref):
    # x_ref: (Cb, HW) rows = flattened (n, c) planes.
    # alpha_ref / beta_ref: (Cb, 1) per-row affine params (VMEM broadcast).
    x = x_ref[...].astype(jnp.float32)
    hw = x.shape[-1]
    inv_hw = jnp.float32(1.0 / hw)

    # One pass over x: the two reductions are independent of each other.
    s1 = jnp.sum(x, axis=-1, keepdims=True)             # (Cb, 1)
    s2 = jnp.sum(x * x, axis=-1, keepdims=True)         # (Cb, 1)
    mean = s1 * inv_hw
    var = jnp.maximum(s2 * inv_hw - mean * mean, 0.0)   # biased variance (IN)
    inv = jax.lax.rsqrt(var + EPS)                      # EUP op -> cheap

    # out = alpha * (x - mean) * inv + beta  ==  x * scale + shift
    scale = alpha_ref[...].astype(jnp.float32) * inv    # (Cb, 1)
    shift = beta_ref[...].astype(jnp.float32) - mean * scale
    o_ref[...] = (x * scale + shift).astype(o_ref.dtype)


def _pick_block_rows(rows, hw, itemsize, budget_bytes=4 * 1024 * 1024):
    """Largest divisor of `rows` that is sublane-aligned (multiple of 8, or
    equal to `rows`) and keeps one block under ~budget_bytes.  With in+out
    double-buffered this stays well inside scoped VMEM on v5e/v6e/v7x."""
    cands = [d for d in range(1, rows + 1)
             if rows % d == 0 and (d % 8 == 0 or d == rows)]
    fitting = [d for d in cands if d * hw * itemsize <= budget_bytes]
    if fitting:
        return max(fitting)
    return min(cands)  # smallest legal block; still correct if over budget
    # TODO(synk): for very large H*W (even Cb==1 over budget), add a second
    # "arbitrary" grid axis over H*W chunks with sum/sumsq accumulators and a
    # second normalization pass.


def c_instance_norm(x, y, alpha_weight, beta_weight, block_rows=None):
    """x: (N, C, H, W), y: (N,) int32 labels.
    alpha_weight / beta_weight: (nlabels, C) embedding tables."""
    N, C, H, W = x.shape
    HW = H * W
    R = N * C

    # Embedding lookup = tiny gather; keep as plain JAX glue and broadcast to
    # one scalar per (n, c) row.
    alpha = alpha_weight[y].astype(jnp.float32).reshape(R, 1)   # (N*C, 1)
    beta = beta_weight[y].astype(jnp.float32).reshape(R, 1)     # (N*C, 1)

    # Free reshape for contiguous NCHW: lane-dense last dim.
    x2 = x.reshape(R, HW)

    if block_rows is None:
        block_rows = _pick_block_rows(R, HW, jnp.dtype(x.dtype).itemsize)
    Cb = block_rows
    assert R % Cb == 0

    out = pl.pallas_call(
        _cin_kernel,
        out_shape=jax.ShapeDtypeStruct((R, HW), x.dtype),
        grid=(R // Cb,),
        in_specs=[
            pl.BlockSpec((Cb, HW), lambda i: (i, 0)),
            pl.BlockSpec((Cb, 1), lambda i: (i, 0)),
            pl.BlockSpec((Cb, 1), lambda i: (i, 0)),
        ],
        out_specs=pl.BlockSpec((Cb, HW), lambda i: (i, 0)),
        compiler_params=pltpu.CompilerParams(
            dimension_semantics=("parallel",)),
    )(x2, alpha, beta)

    return out.reshape(N, C, H, W)


def reference(x, y, alpha_weight, beta_weight):
    mean = jnp.mean(x, axis=(2, 3), keepdims=True)
    var = jnp.mean((x - mean) ** 2, axis=(2, 3), keepdims=True)
    out = (x - mean) * jax.lax.rsqrt(var + EPS)
    alpha = alpha_weight[y][:, :, None, None]
    beta = beta_weight[y][:, :, None, None]
    return alpha * out + beta


if __name__ == "__main__":
    nfilter, nlabels = 4, 10
    N, H, W = 2, 16, 16

    key = jax.random.PRNGKey(0)
    kx, ky, ka = jax.random.split(key, 3)

    x = jax.random.normal(kx, (N, nfilter, H, W), dtype=jnp.float32)
    y = jax.random.randint(ky, (N,), 0, nlabels, dtype=jnp.int32)

    # Deterministic parameter init (mirrors nn.init.uniform(-1,1) / constant 0)
    alpha_weight = jax.random.uniform(ka, (nlabels, nfilter),
                                      minval=-1.0, maxval=1.0,
                                      dtype=jnp.float32)
    beta_weight = jnp.zeros((nlabels, nfilter), dtype=jnp.float32)

    out = c_instance_norm(x, y, alpha_weight, beta_weight)
    out = jax.block_until_ready(out)

    ref = reference(x, y, alpha_weight, beta_weight)
    assert out.shape == (N, nfilter, H, W)
    assert jnp.allclose(out, ref, atol=1e-5, rtol=1e-5)

    print("KERNEL_OK")
</pallas_src>

<mosaic_0001>
module attributes {stable_mosaic.version = 11 : i64} {
  func.func @_cin_kernel(%arg0: i32, %arg1: memref<8x256xf32, #tpu.memory_space<vmem>>, %arg2: memref<8x1xf32, #tpu.memory_space<vmem>>, %arg3: memref<8x1xf32, #tpu.memory_space<vmem>>, %arg4: memref<8x256xf32, #tpu.memory_space<vmem>>) attributes {dimension_semantics = [#tpu.dimension_semantics<parallel>], iteration_bounds = array<i64: 1>, scalar_prefetch = 0 : i64, scratch_operands = 0 : i64, tpu.core_type = #tpu.core_type<tc>, window_params = [{transform_indices = @transform_0, window_bounds = array<i64: 8, 256>}, {transform_indices = @transform_1, window_bounds = array<i64: 8, 1>}, {transform_indices = @transform_2, window_bounds = array<i64: 8, 1>}, {transform_indices = @transform_3, window_bounds = array<i64: 8, 256>}]} {
    %c0 = arith.constant 0 : index
    %c0_0 = arith.constant 0 : index
    %0 = vector.load %arg1[%c0, %c0_0] : memref<8x256xf32, #tpu.memory_space<vmem>>, vector<8x256xf32>
    %cst = arith.constant dense<0.000000e+00> : vector<8xf32>
    %1 = vector.multi_reduction <add>, %0, %cst [1] : vector<8x256xf32> to vector<8xf32>
    %2 = vector.shape_cast %1 : vector<8xf32> to vector<8x1xf32>
    %3 = arith.mulf %0, %0 : vector<8x256xf32>
    %cst_1 = arith.constant dense<0.000000e+00> : vector<8xf32>
    %4 = vector.multi_reduction <add>, %3, %cst_1 [1] : vector<8x256xf32> to vector<8xf32>
    %5 = vector.shape_cast %4 : vector<8xf32> to vector<8x1xf32>
    %cst_2 = arith.constant 3.906250e-03 : f32
    %6 = vector.broadcast %cst_2 : f32 to vector<8x1xf32>
    %7 = arith.mulf %2, %6 : vector<8x1xf32>
    %cst_3 = arith.constant 3.906250e-03 : f32
    %8 = vector.broadcast %cst_3 : f32 to vector<8x1xf32>
    %9 = arith.mulf %5, %8 : vector<8x1xf32>
    %10 = arith.mulf %7, %7 : vector<8x1xf32>
    %11 = arith.subf %9, %10 : vector<8x1xf32>
    %cst_4 = arith.constant 0.000000e+00 : f32
    %12 = vector.broadcast %cst_4 : f32 to vector<8x1xf32>
    %13 = arith.maximumf %11, %12 : vector<8x1xf32>
    %cst_5 = arith.constant 9.99999974E-6 : f32
    %14 = vector.broadcast %cst_5 : f32 to vector<8x1xf32>
    %15 = arith.addf %13, %14 : vector<8x1xf32>
    %16 = math.rsqrt %15 : vector<8x1xf32>
    %c0_6 = arith.constant 0 : index
    %c0_7 = arith.constant 0 : index
    %17 = vector.load %arg2[%c0_6, %c0_7] : memref<8x1xf32, #tpu.memory_space<vmem>>, vector<8x1xf32>
    %18 = arith.mulf %17, %16 : vector<8x1xf32>
    %c0_8 = arith.constant 0 : index
    %c0_9 = arith.constant 0 : index
    %19 = vector.load %arg3[%c0_8, %c0_9] : memref<8x1xf32, #tpu.memory_space<vmem>>, vector<8x1xf32>
    %20 = arith.mulf %7, %18 : vector<8x1xf32>
    %21 = arith.subf %19, %20 : vector<8x1xf32>
    %22 = vector.broadcast %18 : vector<8x1xf32> to vector<8x256xf32>
    %23 = arith.mulf %0, %22 : vector<8x256xf32>
    %24 = vector.broadcast %21 : vector<8x1xf32> to vector<8x256xf32>
    %25 = arith.addf %23, %24 : vector<8x256xf32>
    %c0_10 = arith.constant 0 : index
    %c0_11 = arith.constant 0 : index
    %26 = vector.load %arg4[%c0_10, %c0_11] : memref<8x256xf32, #tpu.memory_space<vmem>>, vector<8x256xf32>
    tpu.vector_store %arg4[%c0_10, %c0_11], %25 {strides = array<i32>} : memref<8x256xf32, #tpu.memory_space<vmem>>, vector<8x256xf32>,
    return
  }
  func.func @transform_0(%arg0: i32) -> (i32, i32) {
    %c0_i32 = arith.constant 0 : i32
    %c0_i32_0 = arith.constant 0 : i32
    return %arg0, %c0_i32 : i32, i32
  }
  func.func @transform_1(%arg0: i32) -> (i32, i32) {
    %c0_i32 = arith.constant 0 : i32
    %c0_i32_0 = arith.constant 0 : i32
    return %arg0, %c0_i32 : i32, i32
  }
  func.func @transform_2(%arg0: i32) -> (i32, i32) {
    %c0_i32 = arith.constant 0 : i32
    %c0_i32_0 = arith.constant 0 : i32
    return %arg0, %c0_i32 : i32, i32
  }
  func.func @transform_3(%arg0: i32) -> (i32, i32) {
    %c0_i32 = arith.constant 0 : i32
    %c0_i32_0 = arith.constant 0 : i32
    return %arg0, %c0_i32 : i32, i32
  }
}

</mosaic_0001>

<bundles_post_ra>
// kernel: tpu_custom_call.1
= control target key start
LH: loop header
LB: loop body
LE: loop exit
PB: predicated region body
PF: predicated region fallthrough
CT: control target
= control target key end

     0   :  { %s132_s0 = inlined_call_operand.vmem [shape: f32[8,256], index: 0, kind: input, shape index: {}]   ;;  %s133_s1 = inlined_call_operand.vmem [shape: f32[8,1], index: 1, kind: input, shape index: {}]   ;;  %s134_s2 = inlined_call_operand.vmem [shape: f32[8,1], index: 2, kind: input, shape index: {}]   ;;  %s135_s3 = inlined_call_operand.hbm [shape: f32[8,256], index: 3, kind: output, shape index: {}]  }
   0x1   :  { %v15_v0 = vld [vmem:[%s132_s0] sm:$0xff]  ;;  %v16_v1 = vld [vmem:[%s132_s0 + $0x8] sm:$0xff] }
   0x2   :  { %8 = vsyncpa [#allocation3], 0  ;;  %v17_v2 = vadd.f32 %v16_v1, %v15_v0  ;;  %v20_v3 = vmul.f32 %v15_v0, %v15_v0  ;;  %v21_v4 = vmul.f32 %v16_v1, %v16_v1  ;;  %v95_v6 = vmov 0   ;;  %v32_v15 = vld [vmem:[%s133_s1] sm:$0xff]  ;;  %s96_s19 = smov [#allocation2]  }
   0x3   :  { %69 = vset.pattern.permute.xlu1 %v95_v6  ;;  %70 = vset.pattern.permute.xlu0 %v95_v6  ;;  %v34_v18 = vld [vmem:[%s134_s2] sm:$0xff]  ;;  %s59_s20 = sshll.u32 %s96_s19, 4  ;;  %s60_s20 = int_to_ptr.vmem [resolvable:$true] %s59_s20 }
   0x4   :  { %18 = vadd.xlane.f32.xlu0 %v17_v2  ;;  %v22_v5 = vadd.f32 %v21_v4, %v20_v3  ;;  %s73_s1 = scalar_lea.vmem %s60_s20, 256  ;;  %p78_p1 = scmp.lt.s32.totalorder %s60_s20, %s60_s20 }
   0x5   :  { %p74_p0 = scmp.ne.s32.totalorder %s60_s20, %s73_s1  ;;  %p79_p2 = scmp.lt.s32.totalorder %s73_s1, %s73_s1 }
   0x7   :  { %p80_p3 = por %p79_p2, %p78_p1 }
   0x8   :  { %23 = vadd.xlane.f32.xlu0 %v22_v5 }
   0x9   :  { %p81_p4 = pnand %p80_p3, %p74_p0 }
  0x8d   :  { %v19_v7 = vpop.xlane.xlu0 %18 }
  0x8e   :  { %v25_v8 = vmul.f32 0.00390625, %v19_v7 }
  0x90   :  { %v27_v10 = vmul.f32 %v25_v8, %v25_v8 }
  0x91   :  { %v24_v9 = vpop.xlane.xlu0 %23 }
  0x92   :  { %v26_v11 = vmul.f32 0.00390625, %v24_v9 }
  0x94   :  { %v28_v12 = vsub.f32 %v26_v11, %v27_v10 }
  0x96   :  { %v29_v13 = vmax.f32 %v28_v12, 0.0 }
  0x98   :  { %v30_v14 = vadd.f32 1e-05, %v29_v13 }
  0x9a   :  { %71 = vrsqrt.f32 %v30_v14 }
  0xa7   :  { %v72_v16 = vpop.eup %71 }
  0xa8   :  { %v33_v17 = vmul.f32 %v72_v16, %v32_v15 }
  0xaa   :  { %39 = vperm.xlu1 %69, %v33_v17   ;;  %v35_v19 = vmul.f32 %v33_v17, %v25_v8 }
  0xac   :  { %v36_v20 = vsub.f32 %v34_v18, %v35_v19 }
  0xae   :  { %46 = vperm.xlu1 %69, %v36_v20  }
 0x125   :  { %v40_v21 = vpop.permute.xlu1 %39 }
 0x126   :  { %v42_v22 = vmul.f32 %v40_v21, %v15_v0  ;;  %v43_v23 = vmul.f32 %v40_v21, %v16_v1 }
 0x129   :  { %v47_v24 = vpop.permute.xlu1 %46 }
 0x12a   :  { %v49_v25 = vadd.f32 %v47_v24, %v42_v22  ;;  %v50_v26 = vadd.f32 %v47_v24, %v43_v23 }
 0x12c   :  { %51 = vst [vmem:[#allocation2] sm:$0xff] %v49_v25  ;;  %52 = vst [vmem:[#allocation2 + $0x8] sm:$0xff] %v50_v26 }
 0x12d   :  { %84 = shalt.err (!%p81_p4)
}
 0x12e   :  { %62 = dma.vmem_to_hbm [thread:$0]  %s60_s20, 256, %s135_s3, [#allocation3]  }
 0x12f   :  { %93 = dma.done.wait [#allocation3], 256  }
 0x130   :  { %94 = vsyncadd [#allocation3], 4294967040 }
 0x131   :  { %66 = vsyncpa [#allocation3], 1 }

</bundles_post_ra>
